<compile_context>
chip_gen: v7x
topology: tpu7x:2x2x1
jax: 0.10.0
libtpu: 0.0.40
codegen_flags: <defaults>
</compile_context>

<pallas_src>
import jax
import jax.numpy as jnp
from jax.experimental import pallas as pl
from jax.experimental.pallas import tpu as pltpu


def _round_up(n, m):
    return ((n + m - 1) // m) * m


def _mlp_softmax_kernel(x_ref,
                        w1_ref, b1_ref,
                        w2_ref, b2_ref,
                        w3_ref, b3_ref,
                        w4_ref, b4_ref,
                        o_ref):
    """Fused MLP: 3x (Linear + ReLU) followed by Linear + Softmax(dim=1).

    x arrives as f32 and is cast to bf16 in-kernel (VPU, free); matmuls run on
    the MXU in bf16 with f32 accumulation; bias add / softmax stay in f32; the
    result is stored at the true class width in o_ref.dtype (bf16 by default).
    """
    x = x_ref[...].astype(jnp.bfloat16)  # (tb, n_in) f32 -> bf16 in-kernel

    # hiddenLayer1: Linear + ReLU
    h1 = jnp.dot(x, w1_ref[...], preferred_element_type=jnp.float32) + b1_ref[...]
    h1 = jnp.maximum(h1, 0.0).astype(jnp.bfloat16)

    # hiddenLayer2: Linear + ReLU
    h2 = jnp.dot(h1, w2_ref[...], preferred_element_type=jnp.float32) + b2_ref[...]
    h2 = jnp.maximum(h2, 0.0).astype(jnp.bfloat16)

    # hiddenLayer3: Linear + ReLU
    h3 = jnp.dot(h2, w3_ref[...], preferred_element_type=jnp.float32) + b3_ref[...]
    h3 = jnp.maximum(h3, 0.0).astype(jnp.bfloat16)

    # outLayer: Linear + Softmax over the (true-width) class axis.
    logits = jnp.dot(h3, w4_ref[...], preferred_element_type=jnp.float32) + b4_ref[...]
    m = jnp.max(logits, axis=1, keepdims=True)
    e = jnp.exp(logits - m)
    denom = jnp.sum(e, axis=1, keepdims=True)
    o_ref[...] = (e / denom).astype(o_ref.dtype)  # exact normalization


def fc_classifier_net_forward(x, params, *, block_batch=2048, out_dtype=jnp.bfloat16):
    """x: (batch, nInput) f32.  params: w1..w4 in (in, out) layout, b1..b4 (1, out).

    Returns softmax probabilities of shape (batch, nOut) in `out_dtype`.
    """
    batch, n_in = x.shape
    n_out = params["w4"].shape[1]

    # ---- batch tiling ------------------------------------------------------
    # Biggest tile up to block_batch (multiple of 8), but keep >= 2 grid steps
    # whenever batch allows so both v7x TensorCores engage on the parallel axis.
    tb_cap = max(8, _round_up(block_batch, 8))
    n_blocks = max(pl.cdiv(batch, tb_cap), 2 if batch >= 16 else 1)
    tb = _round_up(pl.cdiv(batch, n_blocks), 8)
    n_blocks = pl.cdiv(batch, tb)  # ragged final block handled by Pallas

    # ---- params: bf16 weights (MXU-native), f32 biases (f32 accumulator) ----
    w1 = params["w1"].astype(jnp.bfloat16)
    w2 = params["w2"].astype(jnp.bfloat16)
    w3 = params["w3"].astype(jnp.bfloat16)
    w4 = params["w4"].astype(jnp.bfloat16)   # true width; no class-dim padding
    b1 = params["b1"].astype(jnp.float32)
    b2 = params["b2"].astype(jnp.float32)
    b3 = params["b3"].astype(jnp.float32)
    b4 = params["b4"].astype(jnp.float32)

    def _batch_tiled(shape):
        # activation / output spec: tiled along the batch grid axis
        return pl.BlockSpec(shape, lambda i: (i, 0))

    def _resident(shape):
        # weight / bias spec: same block every grid step -> stays resident in VMEM
        return pl.BlockSpec(shape, lambda i: (0, 0))

    in_specs = [
        _batch_tiled((tb, n_in)),
        _resident(w1.shape), _resident(b1.shape),
        _resident(w2.shape), _resident(b2.shape),
        _resident(w3.shape), _resident(b3.shape),
        _resident(w4.shape), _resident(b4.shape),
    ]
    out_spec = _batch_tiled((tb, n_out))

    return pl.pallas_call(
        _mlp_softmax_kernel,
        out_shape=jax.ShapeDtypeStruct((batch, n_out), out_dtype),
        grid=(n_blocks,),
        in_specs=in_specs,
        out_specs=out_spec,
        compiler_params=pltpu.CompilerParams(
            dimension_semantics=("parallel",),
            # A few MB of pipelined buffers + f32 intermediates even at tb=4096;
            # 32 MiB is safe on every generation incl. v7x's 64 MiB ceiling.
            vmem_limit_bytes=32 * 1024 * 1024,
        ),
    )(x, w1, b1, w2, b2, w3, b3, w4, b4)


def init_params(key, n_input, n_h1, n_h2, n_h3, n_out):
    """Deterministic synthetic init (PyTorch Linear-style uniform fan-in bounds)."""
    def linear(key, fan_in, fan_out):
        k_w, k_b = jax.random.split(key)
        bound = 1.0 / jnp.sqrt(float(fan_in))
        # Stored already transposed: (fan_in, fan_out) so kernel does x @ W.
        w = jax.random.uniform(k_w, (fan_in, fan_out), jnp.float32, -bound, bound)
        b = jax.random.uniform(k_b, (1, fan_out), jnp.float32, -bound, bound)
        return w, b

    k1, k2, k3, k4 = jax.random.split(key, 4)
    w1, b1 = linear(k1, n_input, n_h1)
    w2, b2 = linear(k2, n_h1, n_h2)
    w3, b3 = linear(k3, n_h2, n_h3)
    w4, b4 = linear(k4, n_h3, n_out)
    return dict(w1=w1, b1=b1, w2=w2, b2=b2, w3=w3, b3=b3, w4=w4, b4=b4)


def _reference_forward(x, params):
    """Plain-JAX reference using the same bf16-matmul / f32-accumulate recipe."""
    def lin(h, w, b):
        return jnp.dot(h.astype(jnp.bfloat16), w.astype(jnp.bfloat16),
                       preferred_element_type=jnp.float32) + b
    h = jnp.maximum(lin(x, params["w1"], params["b1"]), 0.0)
    h = jnp.maximum(lin(h, params["w2"], params["b2"]), 0.0)
    h = jnp.maximum(lin(h, params["w3"], params["b3"]), 0.0)
    logits = lin(h, params["w4"], params["b4"])
    return jax.nn.softmax(logits, axis=1)


if __name__ == "__main__":
    key = jax.random.PRNGKey(0)
    k_x, k_p = jax.random.split(key)

    # Small shapes consistent with the module: batch=8, nInput=32,
    # nHidden1=64, nHidden2=64, nHidden3=32, nOut=16.
    batch, n_input, n_h1, n_h2, n_h3, n_out = 8, 32, 64, 64, 32, 16

    params = init_params(k_p, n_input, n_h1, n_h2, n_h3, n_out)
    x = jax.random.normal(k_x, (batch, n_input), jnp.float32)

    out = jax.block_until_ready(fc_classifier_net_forward(x, params))
    ref = _reference_forward(x, params)

    assert out.shape == (batch, n_out)
    out_f32 = out.astype(jnp.float32)
    assert bool(jnp.all(jnp.isfinite(out_f32)))
    assert jnp.allclose(out_f32, ref, atol=1e-2, rtol=2e-2)
    assert jnp.allclose(jnp.sum(out_f32, axis=1), 1.0, atol=1e-2)

    # Also exercise the multi-block (>=2 grid steps, v7x dual-TC path) and the
    # ragged-final-block path removed wrapper padding now relies on.
    for b2 in (48, 20):
        xb = jax.random.normal(jax.random.fold_in(k_x, b2), (b2, n_input), jnp.float32)
        ob = jax.block_until_ready(fc_classifier_net_forward(xb, params))
        rb = _reference_forward(xb, params)
        assert ob.shape == (b2, n_out)
        assert jnp.allclose(ob.astype(jnp.float32), rb, atol=1e-2, rtol=2e-2)
        assert jnp.allclose(jnp.sum(ob.astype(jnp.float32), axis=1), 1.0, atol=1e-2)

    print("KERNEL_OK")
</pallas_src>

<mosaic_0001>
module attributes {stable_mosaic.version = 11 : i64} {
  func.func @_mlp_softmax_kernel(%arg0: i32, %arg1: memref<8x32xf32, #tpu.memory_space<vmem>>, %arg2: memref<32x64xbf16, #tpu.memory_space<vmem>>, %arg3: memref<1x64xf32, #tpu.memory_space<vmem>>, %arg4: memref<64x64xbf16, #tpu.memory_space<vmem>>, %arg5: memref<1x64xf32, #tpu.memory_space<vmem>>, %arg6: memref<64x32xbf16, #tpu.memory_space<vmem>>, %arg7: memref<1x32xf32, #tpu.memory_space<vmem>>, %arg8: memref<32x16xbf16, #tpu.memory_space<vmem>>, %arg9: memref<1x16xf32, #tpu.memory_space<vmem>>, %arg10: memref<8x16xbf16, #tpu.memory_space<vmem>>) attributes {dimension_semantics = [#tpu.dimension_semantics<parallel>], iteration_bounds = array<i64: 1>, scalar_prefetch = 0 : i64, scratch_operands = 0 : i64, tpu.core_type = #tpu.core_type<tc>, window_params = [{transform_indices = @transform_0, window_bounds = array<i64: 8, 32>}, {pipeline_mode = #tpu.pipeline_mode<synchronous>, transform_indices = @transform_1, window_bounds = array<i64: 32, 64>}, {pipeline_mode = #tpu.pipeline_mode<synchronous>, transform_indices = @transform_2, window_bounds = array<i64: 1, 64>}, {pipeline_mode = #tpu.pipeline_mode<synchronous>, transform_indices = @transform_3, window_bounds = array<i64: 64, 64>}, {pipeline_mode = #tpu.pipeline_mode<synchronous>, transform_indices = @transform_4, window_bounds = array<i64: 1, 64>}, {pipeline_mode = #tpu.pipeline_mode<synchronous>, transform_indices = @transform_5, window_bounds = array<i64: 64, 32>}, {pipeline_mode = #tpu.pipeline_mode<synchronous>, transform_indices = @transform_6, window_bounds = array<i64: 1, 32>}, {pipeline_mode = #tpu.pipeline_mode<synchronous>, transform_indices = @transform_7, window_bounds = array<i64: 32, 16>}, {pipeline_mode = #tpu.pipeline_mode<synchronous>, transform_indices = @transform_8, window_bounds = array<i64: 1, 16>}, {transform_indices = @transform_9, window_bounds = array<i64: 8, 16>}]} {
    %c0 = arith.constant 0 : index
    %c0_0 = arith.constant 0 : index
    %0 = vector.load %arg1[%c0, %c0_0] : memref<8x32xf32, #tpu.memory_space<vmem>>, vector<8x32xf32>
    %1 = arith.truncf %0 : vector<8x32xf32> to vector<8x32xbf16>
    %c0_1 = arith.constant 0 : index
    %c0_2 = arith.constant 0 : index
    %2 = vector.load %arg2[%c0_1, %c0_2] : memref<32x64xbf16, #tpu.memory_space<vmem>>, vector<32x64xbf16>
    %cst = arith.constant dense<0.000000e+00> : vector<8x64xf32>
    %3 = tpu.matmul %1, %2, %cst {dimension_numbers = #tpu.dot_dimension_numbers<[1], [0], [0], [1], [0, 0, 1, 1], [], []>} : vector<8x32xbf16>, vector<32x64xbf16>, vector<8x64xf32> -> vector<8x64xf32>
    %c0_3 = arith.constant 0 : index
    %c0_4 = arith.constant 0 : index
    %4 = vector.load %arg3[%c0_3, %c0_4] : memref<1x64xf32, #tpu.memory_space<vmem>>, vector<1x64xf32>
    %5 = vector.broadcast %4 : vector<1x64xf32> to vector<8x64xf32>
    %6 = arith.addf %3, %5 : vector<8x64xf32>
    %cst_5 = arith.constant 0.000000e+00 : f32
    %7 = vector.broadcast %cst_5 : f32 to vector<8x64xf32>
    %8 = arith.maximumf %6, %7 : vector<8x64xf32>
    %9 = arith.truncf %8 : vector<8x64xf32> to vector<8x64xbf16>
    %c0_6 = arith.constant 0 : index
    %c0_7 = arith.constant 0 : index
    %10 = vector.load %arg4[%c0_6, %c0_7] : memref<64x64xbf16, #tpu.memory_space<vmem>>, vector<64x64xbf16>
    %cst_8 = arith.constant dense<0.000000e+00> : vector<8x64xf32>
    %11 = tpu.matmul %9, %10, %cst_8 {dimension_numbers = #tpu.dot_dimension_numbers<[1], [0], [0], [1], [0, 0, 1, 1], [], []>} : vector<8x64xbf16>, vector<64x64xbf16>, vector<8x64xf32> -> vector<8x64xf32>
    %c0_9 = arith.constant 0 : index
    %c0_10 = arith.constant 0 : index
    %12 = vector.load %arg5[%c0_9, %c0_10] : memref<1x64xf32, #tpu.memory_space<vmem>>, vector<1x64xf32>
    %13 = vector.broadcast %12 : vector<1x64xf32> to vector<8x64xf32>
    %14 = arith.addf %11, %13 : vector<8x64xf32>
    %cst_11 = arith.constant 0.000000e+00 : f32
    %15 = vector.broadcast %cst_11 : f32 to vector<8x64xf32>
    %16 = arith.maximumf %14, %15 : vector<8x64xf32>
    %17 = arith.truncf %16 : vector<8x64xf32> to vector<8x64xbf16>
    %c0_12 = arith.constant 0 : index
    %c0_13 = arith.constant 0 : index
    %18 = vector.load %arg6[%c0_12, %c0_13] : memref<64x32xbf16, #tpu.memory_space<vmem>>, vector<64x32xbf16>
    %cst_14 = arith.constant dense<0.000000e+00> : vector<8x32xf32>
    %19 = tpu.matmul %17, %18, %cst_14 {dimension_numbers = #tpu.dot_dimension_numbers<[1], [0], [0], [1], [0, 0, 1, 1], [], []>} : vector<8x64xbf16>, vector<64x32xbf16>, vector<8x32xf32> -> vector<8x32xf32>
    %c0_15 = arith.constant 0 : index
    %c0_16 = arith.constant 0 : index
    %20 = vector.load %arg7[%c0_15, %c0_16] : memref<1x32xf32, #tpu.memory_space<vmem>>, vector<1x32xf32>
    %21 = vector.broadcast %20 : vector<1x32xf32> to vector<8x32xf32>
    %22 = arith.addf %19, %21 : vector<8x32xf32>
    %cst_17 = arith.constant 0.000000e+00 : f32
    %23 = vector.broadcast %cst_17 : f32 to vector<8x32xf32>
    %24 = arith.maximumf %22, %23 : vector<8x32xf32>
    %25 = arith.truncf %24 : vector<8x32xf32> to vector<8x32xbf16>
    %c0_18 = arith.constant 0 : index
    %c0_19 = arith.constant 0 : index
    %26 = vector.load %arg8[%c0_18, %c0_19] : memref<32x16xbf16, #tpu.memory_space<vmem>>, vector<32x16xbf16>
    %cst_20 = arith.constant dense<0.000000e+00> : vector<8x16xf32>
    %27 = tpu.matmul %25, %26, %cst_20 {dimension_numbers = #tpu.dot_dimension_numbers<[1], [0], [0], [1], [0, 0, 1, 1], [], []>} : vector<8x32xbf16>, vector<32x16xbf16>, vector<8x16xf32> -> vector<8x16xf32>
    %c0_21 = arith.constant 0 : index
    %c0_22 = arith.constant 0 : index
    %28 = vector.load %arg9[%c0_21, %c0_22] : memref<1x16xf32, #tpu.memory_space<vmem>>, vector<1x16xf32>
    %29 = vector.broadcast %28 : vector<1x16xf32> to vector<8x16xf32>
    %30 = arith.addf %27, %29 : vector<8x16xf32>
    %cst_23 = arith.constant dense<0xFF800000> : vector<8xf32>
    %31 = vector.multi_reduction <maximumf>, %30, %cst_23 [1] : vector<8x16xf32> to vector<8xf32>
    %32 = vector.shape_cast %31 : vector<8xf32> to vector<8x1xf32>
    %33 = vector.broadcast %32 : vector<8x1xf32> to vector<8x16xf32>
    %34 = arith.subf %30, %33 : vector<8x16xf32>
    %35 = math.exp %34 : vector<8x16xf32>
    %cst_24 = arith.constant dense<0.000000e+00> : vector<8xf32>
    %36 = vector.multi_reduction <add>, %35, %cst_24 [1] : vector<8x16xf32> to vector<8xf32>
    %37 = vector.shape_cast %36 : vector<8xf32> to vector<8x1xf32>
    %38 = vector.broadcast %37 : vector<8x1xf32> to vector<8x16xf32>
    %39 = arith.divf %35, %38 : vector<8x16xf32>
    %40 = arith.truncf %39 : vector<8x16xf32> to vector<8x16xbf16>
    %c0_25 = arith.constant 0 : index
    %c0_26 = arith.constant 0 : index
    %41 = vector.load %arg10[%c0_25, %c0_26] : memref<8x16xbf16, #tpu.memory_space<vmem>>, vector<8x16xbf16>
    tpu.vector_store %arg10[%c0_25, %c0_26], %40 {strides = array<i32>} : memref<8x16xbf16, #tpu.memory_space<vmem>>, vector<8x16xbf16>,
    return
  }
  func.func @transform_0(%arg0: i32) -> (i32, i32) {
    %c0_i32 = arith.constant 0 : i32
    %c0_i32_0 = arith.constant 0 : i32
    return %arg0, %c0_i32 : i32, i32
  }
  func.func @transform_1(%arg0: i32) -> (i32, i32) {
    %c0_i32 = arith.constant 0 : i32
    %c0_i32_0 = arith.constant 0 : i32
    %c0_i32_1 = arith.constant 0 : i32
    return %c0_i32, %c0_i32_0 : i32, i32
  }
  func.func @transform_2(%arg0: i32) -> (i32, i32) {
    %c0_i32 = arith.constant 0 : i32
    %c0_i32_0 = arith.constant 0 : i32
    %c0_i32_1 = arith.constant 0 : i32
    return %c0_i32, %c0_i32_0 : i32, i32
  }
  func.func @transform_3(%arg0: i32) -> (i32, i32) {
    %c0_i32 = arith.constant 0 : i32
    %c0_i32_0 = arith.constant 0 : i32
    %c0_i32_1 = arith.constant 0 : i32
    return %c0_i32, %c0_i32_0 : i32, i32
  }
  func.func @transform_4(%arg0: i32) -> (i32, i32) {
    %c0_i32 = arith.constant 0 : i32
    %c0_i32_0 = arith.constant 0 : i32
    %c0_i32_1 = arith.constant 0 : i32
    return %c0_i32, %c0_i32_0 : i32, i32
  }
  func.func @transform_5(%arg0: i32) -> (i32, i32) {
    %c0_i32 = arith.constant 0 : i32
    %c0_i32_0 = arith.constant 0 : i32
    %c0_i32_1 = arith.constant 0 : i32
    return %c0_i32, %c0_i32_0 : i32, i32
  }
  func.func @transform_6(%arg0: i32) -> (i32, i32) {
    %c0_i32 = arith.constant 0 : i32
    %c0_i32_0 = arith.constant 0 : i32
    %c0_i32_1 = arith.constant 0 : i32
    return %c0_i32, %c0_i32_0 : i32, i32
  }
  func.func @transform_7(%arg0: i32) -> (i32, i32) {
    %c0_i32 = arith.constant 0 : i32
    %c0_i32_0 = arith.constant 0 : i32
    %c0_i32_1 = arith.constant 0 : i32
    return %c0_i32, %c0_i32_0 : i32, i32
  }
  func.func @transform_8(%arg0: i32) -> (i32, i32) {
    %c0_i32 = arith.constant 0 : i32
    %c0_i32_0 = arith.constant 0 : i32
    %c0_i32_1 = arith.constant 0 : i32
    return %c0_i32, %c0_i32_0 : i32, i32
  }
  func.func @transform_9(%arg0: i32) -> (i32, i32) {
    %c0_i32 = arith.constant 0 : i32
    %c0_i32_0 = arith.constant 0 : i32
    return %arg0, %c0_i32 : i32, i32
  }
}

</mosaic_0001>

<bundles_post_ra>
// kernel: tpu_custom_call.1
= control target key start
LH: loop header
LB: loop body
LE: loop exit
PB: predicated region body
PF: predicated region fallthrough
CT: control target
= control target key end

     0   :  { %v488_v1 = vmov 0.0   ;;  %vm489_vm0 = vmmov 0   ;;  %vm59_vm1 = vcmask 261120   ;;  %s612_s0 = inlined_call_operand.vmem [shape: f32[8,32], index: 0, kind: input, shape index: {}]   ;;  %s613_s1 = inlined_call_operand.vmem [shape: bf16[32,64], index: 1, kind: input, shape index: {}]   ;;  %s614_s2 = inlined_call_operand.vmem [shape: f32[1,64], index: 2, kind: input, shape index: {}]   ;;  %s615_s3 = inlined_call_operand.vmem [shape: bf16[64,64], index: 3, kind: input, shape index: {}]   ;;  %s616_s4 = inlined_call_operand.vmem [shape: f32[1,64], index: 4, kind: input, shape index: {}]   ;;  %s617_s5 = inlined_call_operand.vmem [shape: bf16[64,32], index: 5, kind: input, shape index: {}]   ;;  %s618_s6 = inlined_call_operand.vmem [shape: f32[1,32], index: 6, kind: input, shape index: {}]   ;;  %s619_s7 = inlined_call_operand.vmem [shape: bf16[32,16], index: 7, kind: input, shape index: {}]   ;;  %s620_s8 = inlined_call_operand.vmem [shape: f32[1,16], index: 8, kind: input, shape index: {}]   ;;  %s621_s9 = inlined_call_operand.hbm [shape: bf16[8,16], index: 9, kind: output, shape index: {}]  }
   0x1   :  { %v448_v0 = vld [vmem:[%s613_s1] sm:$0xff]   ;;  %405 = vmatprep.subr.bf16.mxu0 %v488_v1  ;;  %v449_v2 = vld [vmem:[%s613_s1 + $0x8] sm:$0xff]   ;;  %413 = vmatprep.subr.bf16.mxu1 %v488_v1 }
   0x2   :  { %406 = vmatpush3.bf16.msra.mxu0 %v448_v0  ;;  %409 = vmatprep.mubr.msk.bf16.mxu0 %vm489_vm0, %v488_v1  ;;  %v34_v3 = vld [vmem:[%s612_s0] sm:$0xff]  ;;  %v451_v5 = vld [vmem:[%s615_s3 + $0x8] sm:$0xff]  }
   0x3   :  { %407 = vmatprep.subr.bf16.mxu0 %v488_v1  ;;  %v450_v4 = vld [vmem:[%s615_s3] sm:$0xff]   ;;  %421 = vmatprep.mubr.msk.bf16.mxu1 %vm489_vm0, %v488_v1  ;;  %v35_v6 = vpack.c.bf16 %v34_v3, %v34_v3 }
   0x4   :  { %414 = vmatpush3.bf16.msra.mxu1 %v450_v4 }
   0x5   :  { %415 = vmatprep.subr.bf16.mxu1 %v488_v1 }
   0x6   :  { %408 = vmatpush3.bf16.msra.mxu0 %v449_v2 }
   0x7   :  { %425 = vmatprep.subr.bf16.mxu0 %v488_v1 }
   0x8   :  { %416 = vmatpush3.bf16.msra.mxu1 %v451_v5 }
   0x9   :  { %410 = vmatmul.mubr.msk.bf16.vlgmr.msra.gmra.mrb[0].mxu0 %vm59_vm1, %v35_v6  ;;  %417 = vmatprep.subr.bf16.mxu1 %v488_v1 }
   0xa   :  { %433 = vmatprep.mubr.msk.bf16.mxu0 %vm489_vm0, %v488_v1 }
   0xb   :  { %14 = vsyncpa [#allocation3], 0  ;;  %v452_v7 = vld [vmem:[%s615_s3 + $0x10] sm:$0xff]   ;;  %v453_v8 = vld [vmem:[%s615_s3 + $0x18] sm:$0xff]   ;;  %vm144_vm2 = vcmask 523264   ;;  %vm340_vm3 = vcmask 130048  }
   0xc   :  { %418 = vmatpush3.bf16.msra.mxu1 %v452_v7  ;;  %v454_v9 = vld [vmem:[%s617_s5] sm:$0xff]   ;;  %v455_v10 = vld [vmem:[%s617_s5 + $0x8] sm:$0xff]   ;;  %v456_v19 = vld [vmem:[%s617_s5 + $0x10] sm:$0xff]   ;;  %vm353_vm4 = vcmask 125952  }
   0xd   :  { %419 = vmatprep.subr.bf16.mxu1 %v488_v1  ;;  %426 = vmatpush3.bf16.msra.mxu0 %v454_v9  ;;  %v369_v11 = vld [vmem:[%s614_s2] ss:$0 sm:$0xff]  ;;  %v457_v20 = vld [vmem:[%s617_s5 + $0x18] sm:$0xff]   ;;  %v459_v30 = vld [vmem:[%s619_s7 + $0x8] sm:$0xff]  }
   0xe   :  { %427 = vmatprep.subr.bf16.mxu0 %v488_v1  ;;  %v458_v21 = vld [vmem:[%s619_s7] sm:$0xff]  }
   0xf   :  { %v373_v22 = vld [vmem:[%s616_s4] ss:$0 sm:$0xff] }
  0x10   :  { %420 = vmatpush3.bf16.msra.mxu1 %v453_v8  ;;  %v379_v31 = vld [vmem:[%s618_s6] ss:$0 sm:$0xff]  ;;  %s490_s6 = smov [#allocation2]  }
  0x11   :  { %437 = vmatprep.subr.bf16.mxu1 %v488_v1  ;;  %428 = vmatpush3.bf16.msra.mxu0 %v455_v10  ;;  %v385_v39 = vld [vmem:[%s620_s8] ss:$0 sm:$0xff]  ;;  %s361_s7 = sshll.u32 %s490_s6, 4  ;;  %s362_s7 = int_to_ptr.vmem [resolvable:$true] %s361_s7 }
  0x12   :  { %429 = vmatprep.subr.bf16.mxu0 %v488_v1  ;;  %s464_s8 = scalar_lea.vmem %s362_s7, 64  ;;  %p469_p1 = scmp.lt.s32.totalorder %s362_s7, %s362_s7 }
  0x13   :  { %p465_p0 = scmp.ne.s32.totalorder %s362_s7, %s464_s8  ;;  %p470_p2 = scmp.lt.s32.totalorder %s464_s8, %s464_s8 }
  0x15   :  { %430 = vmatpush3.bf16.msra.mxu0 %v456_v19  ;;  %p471_p3 = por %p470_p2, %p469_p1 }
  0x16   :  { %431 = vmatprep.subr.bf16.mxu0 %v488_v1 }
  0x17   :  { %p472_p4 = pnand %p471_p3, %p465_p0 }
  0x19   :  { %432 = vmatpush3.bf16.msra.mxu0 %v457_v20 }
  0xdc   :  { %v97_v12 = vpop.f32.mrb[0].mxu0 }
  0xdd   :  { %v98_v13 = vadd.f32 %v369_v11, %v97_v12  ;;  %v411_v14 = vpop.f32.mrb[1].mxu0 }
  0xde   :  { %v100_v15 = vpop.f32.mrb[2].mxu0 }
  0xdf   :  { %v103_v16 = vmax.f32 %v98_v13, 0.0  ;;  %v412_v17 = vpop.f32.mrb[3].mxu0 }
  0xe1   :  { %v104_v18 = vpack.c.bf16 %v103_v16, %v103_v16 }
  0xe3   :  { %422 = vmatmul.mubr.msk.bf16.vlgmr.msra.gmra.mrb[0].mxu1 %vm144_vm2, %v104_v18 }
  0xe4   :  { %441 = vmatprep.mubr.msk.bf16.mxu1 %vm489_vm0, %v488_v1  ;;  %438 = vmatpush3.bf16.msra.mxu1 %v458_v21 }
  0xe5   :  { %439 = vmatprep.subr.bf16.mxu1 %v488_v1 }
  0xe8   :  { %440 = vmatpush3.bf16.msra.mxu1 %v459_v30 }
 0x1b6   :  { %v182_v23 = vpop.f32.mrb[0].mxu1 }
 0x1b7   :  { %v183_v24 = vadd.f32 %v373_v22, %v182_v23  ;;  %v423_v25 = vpop.f32.mrb[1].mxu1 }
 0x1b8   :  { %v185_v26 = vpop.f32.mrb[2].mxu1 }
 0x1b9   :  { %v188_v27 = vmax.f32 %v183_v24, 0.0  ;;  %v424_v28 = vpop.f32.mrb[3].mxu1 }
 0x1bb   :  { %v189_v29 = vpack.c.bf16 %v188_v27, %v188_v27 }
 0x1bd   :  { %434 = vmatmul.mubr.msk.bf16.vlgmr.msra.gmra.mrb[4].mxu0 %vm144_vm2, %v189_v29 }
 0x290   :  { %v266_v32 = vpop.f32.mrb[4].mxu0 }
 0x291   :  { %v267_v33 = vadd.f32 %v379_v31, %v266_v32  ;;  %v435_v34 = vpop.f32.mrb[5].mxu0 }
 0x292   :  { %v269_v35 = vpop.f32.mrb[6].mxu0 }
 0x293   :  { %v272_v36 = vmax.f32 %v267_v33, 0.0  ;;  %v436_v37 = vpop.f32.mrb[7].mxu0 }
 0x295   :  { %v273_v38 = vpack.c.bf16 %v272_v36, %v272_v36 }
 0x297   :  { %442 = vmatmul.mubr.msk.bf16.vlgmr.msra.gmra.mrb[4].mxu1 %vm59_vm1, %v273_v38 }
 0x36a   :  { %v334_v40 = vpop.f32.mrb[4].mxu1 }
 0x36b   :  { %v335_v41 = vadd.f32 %v385_v39, %v334_v40  ;;  %v443_v42 = vpop.f32.mrb[5].mxu1 }
 0x36c   :  { %v337_v43 = vpop.f32.mrb[6].mxu1 }
 0x36d   :  { %v444_v44 = vpop.f32.mrb[7].mxu1  ;;  %v341_v45 = vsel %vm340_vm3, %v335_v41, -inf }
 0x36e   :  { %342 = vmax.xlane.f32.xlu0 %v341_v45 }
 0x3fb   :  { %v343_v46 = vpop.xlane.xlu0 %342 }
 0x3fc   :  { %v344_v47 = vsub.f32 %v335_v41, %v343_v46 }
 0x3fe   :  { %v345_v48 = vmul.f32 1.442695, %v344_v47 }
 0x400   :  { %460 = vpow2.f32 %v345_v48 }
 0x40a   :  { %v461_v49 = vpop.eup %460 }
 0x40b   :  { %v347_v50 = vsel %vm340_vm3, %v461_v49, 0.0 }
 0x40c   :  { %348 = vadd.xlane.f32.xlu0 %v347_v50 }
 0x499   :  { %v349_v51 = vpop.xlane.xlu0 %348 }
 0x49a   :  { %462 = vrcp.f32 %v349_v51 }
 0x4a4   :  { %v463_v52 = vpop.eup %462 }
 0x4a5   :  { %v351_v53 = vmul.f32 %v463_v52, %v461_v49 }
 0x4a7   :  { %v352_v54 = vpack.c.bf16 %v351_v53, %v351_v53 }
 0x4a9   :  { %354 = vst.msk [vmem:[#allocation2] sm:$0xf] %vm353_vm4, %v352_v54 }
 0x4aa   :  { %475 = shalt.err (!%p472_p4)
}
 0x4ab   :  { %s476_s18 = scalar_lea.hbm %s621_s9, 64 }
 0x4ac   :  { %p477_p5 = scmp.ne.s32.totalorder %s621_s9, %s476_s18  ;;  %p480_p6 = scmp.lt.u32.totalorder %s476_s18, %s621_s9 }
 0x4ae   :  { %p482_p7 = pnand %p480_p6, %p477_p5 }
 0x4b0   :  { %485 = shalt.err (!%p482_p7)
}
 0x4b1   :  { %364 = dma.vmem_to_hbm [thread:$0]  %s362_s7, 64, %s621_s9, [#allocation3]  }
 0x4b2   :  { %486 = dma.done.wait [#allocation3], 64  }
 0x4b3   :  { %487 = vsyncadd [#allocation3], 4294967232 }
 0x4b4   :  { %368 = vsyncpa [#allocation3], 1 }

</bundles_post_ra>
